<compile_context>
chip_gen: v7x
topology: tpu7x:2x2x1
jax: 0.10.0
libtpu: 0.0.40
codegen_flags: <defaults>
</compile_context>

<pallas_src>
import functools

import jax
import jax.numpy as jnp
from jax.experimental import pallas as pl
from jax.experimental.pallas import tpu as pltpu


def _round_up(x, m):
    return ((x + m - 1) // m) * m


def _vae_kernel(x_ref, eps_ref, wenc_ref, benc_ref, wdec_ref, bdec_ref,
                z_ref, xhat_ref, kl_ref, se_ref):
    # x_ref:    (TB, D)     f32   (index_map ignores sample axis -> fetched once per tile)
    # eps_ref:  (1, TB, K)  f32
    # wenc_ref: (D, 2K)     bf16  fused [W_mu | W_ls], resident
    # benc_ref: (1, 2K)     f32
    # wdec_ref: (K, D)      bf16  resident
    # bdec_ref: (1, D)      f32
    # z_ref:    (1, TB, K)  f32
    # xhat_ref: (1, TB, D)  bf16  (bf16 writeback halves the dominant HBM stream)
    # kl_ref:   (1, 1, TB)  f32   lane-dense per-row KL terms
    # se_ref:   (1, 1, TB)  f32   lane-dense per-row squared errors
    x_f32 = x_ref[...]
    x_bf = x_f32.astype(jnp.bfloat16)
    eps = eps_ref[0]
    k = eps.shape[-1]

    # ---- fused encoder matmul (bf16 operands, f32 accumulation on the MXU) ----
    enc = jnp.dot(x_bf, wenc_ref[...], preferred_element_type=jnp.float32)
    enc = enc + benc_ref[...]
    mu = enc[:, :k]
    log_s = enc[:, k:]
    s = jnp.exp(log_s)                       # diagonal of cov, positive (f32)

    # ---- reparameterization: bmm(diag(s), eps).squeeze() + mu == s*eps + mu ----
    z = s * eps + mu
    z_ref[0] = z

    # ---- decoder matmul; keep f32 in-register for distortion, store bf16 ----
    x_hat = jnp.dot(z.astype(jnp.bfloat16), wdec_ref[...],
                    preferred_element_type=jnp.float32)
    x_hat = x_hat + bdec_ref[...]
    xhat_ref[0] = x_hat.astype(jnp.bfloat16)

    # ---- per-row stats; final scalar reduction done in JAX so both grid axes
    #      stay "parallel" (no cross-iteration accumulator) ----
    diff = x_hat - x_f32
    se_row = jnp.sum(diff * diff, axis=1)                   # (TB,)
    neg_logdet = -jnp.sum(log_s, axis=1)                    # -log|diag(cov)|
    tr = jnp.sum(s, axis=1)                                 # trace(cov)
    mu_norm = jnp.sqrt(jnp.sum(mu * mu, axis=1))            # torch.norm(mu, p=2, dim=1)
    kl_row = neg_logdet - jnp.float32(k) + tr + mu_norm     # (TB,)
    kl_ref[0, 0] = kl_row
    se_ref[0, 0] = se_row


def _vmem_bytes(tb, d, k):
    # Double-buffered activation tiles + 2x resident weights/biases.
    return (2 * tb * d * 4            # x (f32)
            + 2 * tb * k * 4          # eps
            + 2 * tb * d * 2          # x_hat out (bf16)
            + 2 * tb * k * 4          # z out
            + 4 * tb * 4              # kl/se outs
            + 2 * (d * 2 * k * 2 + 2 * k * 4 + k * d * 2 + d * 4))


def vae_forward(x_nchw, eps, params, num_samples=1, tile_b=512):
    """x_nchw: (B, C, H, W). eps: (B*num_samples, K), sample-major.

    Returns (rate, distortion, Z, X_hat)."""
    b, c, h, w = x_nchw.shape
    d = c * h * w
    k = params["W_mu"].shape[1]
    bn = b * num_samples
    assert eps.shape == (bn, k)

    # Batch tile: prefer a tile that needs no materialized padding copy of X.
    if b <= tile_b:
        tb = b                                   # single batch tile, no pad
    else:
        tb = max(128, _round_up(tile_b, 128))
        budget = 40 * (1 << 20)                  # v7x-safe VMEM budget
        while tb > 128 and _vmem_bytes(tb, d, k) > budget:
            tb //= 2
    b_pad = _round_up(b, tb)
    n_btiles = b_pad // tb

    x_flat = x_nchw.reshape(b, d).astype(jnp.float32)
    eps3 = eps.astype(jnp.float32).reshape(num_samples, b, k)
    if b_pad != b:
        x_flat = jnp.pad(x_flat, ((0, b_pad - b), (0, 0)))
        eps3 = jnp.pad(eps3, ((0, 0), (0, b_pad - b), (0, 0)))

    # Fused encoder weights; bf16 matmul operands, f32 biases.
    w_enc = jnp.concatenate([params["W_mu"], params["W_ls"]], axis=1).astype(jnp.bfloat16)
    b_enc = jnp.concatenate([params["b_mu"], params["b_ls"]], axis=1).astype(jnp.float32)
    w_dec = params["W_dec"].astype(jnp.bfloat16)
    b_dec = params["b_dec"].astype(jnp.float32)

    grid = (n_btiles, num_samples)   # samples innermost -> X tile reused across samples

    in_specs = [
        pl.BlockSpec((tb, d), lambda i, s: (i, 0)),          # X (shared across samples)
        pl.BlockSpec((1, tb, k), lambda i, s: (s, i, 0)),     # eps
        pl.BlockSpec((d, 2 * k), lambda i, s: (0, 0)),        # W_enc (resident)
        pl.BlockSpec((1, 2 * k), lambda i, s: (0, 0)),        # b_enc (resident)
        pl.BlockSpec((k, d), lambda i, s: (0, 0)),            # W_dec (resident)
        pl.BlockSpec((1, d), lambda i, s: (0, 0)),            # b_dec (resident)
    ]
    out_specs = (
        pl.BlockSpec((1, tb, k), lambda i, s: (s, i, 0)),     # Z
        pl.BlockSpec((1, tb, d), lambda i, s: (s, i, 0)),     # X_hat (bf16, flat)
        pl.BlockSpec((1, 1, tb), lambda i, s: (s, 0, i)),     # per-row KL
        pl.BlockSpec((1, 1, tb), lambda i, s: (s, 0, i)),     # per-row SE
    )
    out_shape = (
        jax.ShapeDtypeStruct((num_samples, b_pad, k), jnp.float32),
        jax.ShapeDtypeStruct((num_samples, b_pad, d), jnp.bfloat16),
        jax.ShapeDtypeStruct((num_samples, 1, b_pad), jnp.float32),
        jax.ShapeDtypeStruct((num_samples, 1, b_pad), jnp.float32),
    )

    vmem_limit = int(min(48 * (1 << 20),
                         max(32 * (1 << 20), 2 * _vmem_bytes(tb, d, k))))

    z_pad, xhat_pad, kl_rows, se_rows = pl.pallas_call(
        _vae_kernel,
        grid=grid,
        in_specs=in_specs,
        out_specs=out_specs,
        out_shape=out_shape,
        compiler_params=pltpu.CompilerParams(
            # No cross-iteration state -> both axes independent; lets megacore
            # shard even when n_btiles == 1 (small-batch v7x case).
            dimension_semantics=("parallel", "parallel"),
            vmem_limit_bytes=vmem_limit),
    )(x_flat, eps3, w_enc, b_enc, w_dec, b_dec)

    z = z_pad[:, :b, :].reshape(bn, k)
    x_hat = xhat_pad[:, :b, :].reshape(bn, c, h, w)

    kl_valid = kl_rows[:, 0, :b]                                 # drop padded rows
    se_valid = se_rows[:, 0, :b]
    rate = 0.5 * jnp.mean(kl_valid)                              # mean over B*num_samples rows
    distortion = jnp.sum(se_valid) / jnp.float32(bn)             # X.shape[0] after repeat
    return rate, distortion, z, x_hat


def init_params(key, d, k):
    k1, k2, k3 = jax.random.split(key, 3)
    scale_in = 1.0 / jnp.sqrt(jnp.float32(d))
    scale_code = 1.0 / jnp.sqrt(jnp.float32(k))
    return {
        "W_mu": jax.random.normal(k1, (d, k), jnp.float32) * scale_in,
        "b_mu": jnp.zeros((1, k), jnp.float32),
        "W_ls": jax.random.normal(k2, (d, k), jnp.float32) * scale_in,
        "b_ls": jnp.zeros((1, k), jnp.float32),
        "W_dec": jax.random.normal(k3, (k, d), jnp.float32) * scale_code,
        "b_dec": jnp.zeros((1, d), jnp.float32),
    }


if __name__ == "__main__":
    key = jax.random.PRNGKey(0)
    k_x, k_eps, k_p = jax.random.split(key, 3)

    B, C, H, W = 2, 4, 16, 16        # NCHW input
    K = 32                           # code_dim
    NUM_SAMPLES = 2
    D = C * H * W

    x = jax.random.normal(k_x, (B, C, H, W), jnp.float32)
    eps = jax.random.normal(k_eps, (B * NUM_SAMPLES, K), jnp.float32)
    params = init_params(k_p, D, K)

    fwd = jax.jit(functools.partial(vae_forward, num_samples=NUM_SAMPLES))
    rate, distortion, Z, X_hat = fwd(x, eps, params)
    jax.block_until_ready((rate, distortion, Z, X_hat))

    assert Z.shape == (B * NUM_SAMPLES, K)
    assert X_hat.shape == (B * NUM_SAMPLES, C, H, W)
    assert rate.shape == () and distortion.shape == ()
    assert bool(jnp.isfinite(rate)) and bool(jnp.isfinite(distortion))
    assert bool(jnp.all(jnp.isfinite(Z))) and bool(jnp.all(jnp.isfinite(X_hat.astype(jnp.float32))))
    print("KERNEL_OK")
</pallas_src>

<mosaic_0001>
module attributes {stable_mosaic.version = 11 : i64} {
  func.func @_vae_kernel(%arg0: i32, %arg1: i32, %arg2: memref<2x1024xf32, #tpu.memory_space<vmem>>, %arg3: memref<1x2x32xf32, #tpu.memory_space<vmem>>, %arg4: memref<1024x64xbf16, #tpu.memory_space<vmem>>, %arg5: memref<1x64xf32, #tpu.memory_space<vmem>>, %arg6: memref<32x1024xbf16, #tpu.memory_space<vmem>>, %arg7: memref<1x1024xf32, #tpu.memory_space<vmem>>, %arg8: memref<1x2x32xf32, #tpu.memory_space<vmem>>, %arg9: memref<1x2x1024xbf16, #tpu.memory_space<vmem>>, %arg10: memref<1x1x2xf32, #tpu.memory_space<vmem>>, %arg11: memref<1x1x2xf32, #tpu.memory_space<vmem>>) attributes {dimension_semantics = [#tpu.dimension_semantics<parallel>, #tpu.dimension_semantics<parallel>], iteration_bounds = array<i64: 1, 2>, scalar_prefetch = 0 : i64, scratch_operands = 0 : i64, tpu.core_type = #tpu.core_type<tc>, window_params = [{transform_indices = @transform_0, window_bounds = array<i64: 2, 1024>}, {transform_indices = @transform_1, window_bounds = array<i64: 1, 2, 32>}, {pipeline_mode = #tpu.pipeline_mode<synchronous>, transform_indices = @transform_2, window_bounds = array<i64: 1024, 64>}, {pipeline_mode = #tpu.pipeline_mode<synchronous>, transform_indices = @transform_3, window_bounds = array<i64: 1, 64>}, {pipeline_mode = #tpu.pipeline_mode<synchronous>, transform_indices = @transform_4, window_bounds = array<i64: 32, 1024>}, {pipeline_mode = #tpu.pipeline_mode<synchronous>, transform_indices = @transform_5, window_bounds = array<i64: 1, 1024>}, {transform_indices = @transform_6, window_bounds = array<i64: 1, 2, 32>}, {transform_indices = @transform_7, window_bounds = array<i64: 1, 2, 1024>}, {transform_indices = @transform_8, window_bounds = array<i64: 1, 1, 2>}, {transform_indices = @transform_9, window_bounds = array<i64: 1, 1, 2>}]} {
    %c0 = arith.constant 0 : index
    %c0_0 = arith.constant 0 : index
    %0 = vector.load %arg2[%c0, %c0_0] : memref<2x1024xf32, #tpu.memory_space<vmem>>, vector<2x1024xf32>
    %1 = arith.truncf %0 : vector<2x1024xf32> to vector<2x1024xbf16>
    %c0_1 = arith.constant 0 : index
    %c0_2 = arith.constant 0 : index
    %c0_3 = arith.constant 0 : index
    %2 = vector.load %arg3[%c0_1, %c0_2, %c0_3] : memref<1x2x32xf32, #tpu.memory_space<vmem>>, vector<1x2x32xf32>
    %3 = vector.shape_cast %2 : vector<1x2x32xf32> to vector<2x32xf32>
    %c0_4 = arith.constant 0 : index
    %c0_5 = arith.constant 0 : index
    %4 = vector.load %arg4[%c0_4, %c0_5] : memref<1024x64xbf16, #tpu.memory_space<vmem>>, vector<1024x64xbf16>
    %cst = arith.constant dense<0.000000e+00> : vector<2x64xf32>
    %5 = tpu.matmul %1, %4, %cst {dimension_numbers = #tpu.dot_dimension_numbers<[1], [0], [0], [1], [0, 0, 1, 1], [], []>} : vector<2x1024xbf16>, vector<1024x64xbf16>, vector<2x64xf32> -> vector<2x64xf32>
    %c0_6 = arith.constant 0 : index
    %c0_7 = arith.constant 0 : index
    %6 = vector.load %arg5[%c0_6, %c0_7] : memref<1x64xf32, #tpu.memory_space<vmem>>, vector<1x64xf32>
    %7 = vector.broadcast %6 : vector<1x64xf32> to vector<2x64xf32>
    %8 = arith.addf %5, %7 : vector<2x64xf32>
    %9 = vector.extract_strided_slice %8 {offsets = [0, 0], sizes = [2, 32], strides = [1, 1]} : vector<2x64xf32> to vector<2x32xf32>
    %10 = vector.extract_strided_slice %8 {offsets = [0, 32], sizes = [2, 32], strides = [1, 1]} : vector<2x64xf32> to vector<2x32xf32>
    %11 = math.exp %10 : vector<2x32xf32>
    %12 = arith.mulf %11, %3 : vector<2x32xf32>
    %13 = arith.addf %12, %9 : vector<2x32xf32>
    %c0_8 = arith.constant 0 : index
    %c0_9 = arith.constant 0 : index
    %c0_10 = arith.constant 0 : index
    %14 = vector.load %arg8[%c0_8, %c0_9, %c0_10] : memref<1x2x32xf32, #tpu.memory_space<vmem>>, vector<1x2x32xf32>
    %15 = vector.shape_cast %14 : vector<1x2x32xf32> to vector<2x32xf32>
    %16 = vector.shape_cast %13 : vector<2x32xf32> to vector<1x2x32xf32>
    tpu.vector_store %arg8[%c0_8, %c0_9, %c0_10], %16 {strides = array<i32>} : memref<1x2x32xf32, #tpu.memory_space<vmem>>, vector<1x2x32xf32>,
    %17 = arith.truncf %13 : vector<2x32xf32> to vector<2x32xbf16>
    %c0_11 = arith.constant 0 : index
    %c0_12 = arith.constant 0 : index
    %18 = vector.load %arg6[%c0_11, %c0_12] : memref<32x1024xbf16, #tpu.memory_space<vmem>>, vector<32x1024xbf16>
    %cst_13 = arith.constant dense<0.000000e+00> : vector<2x1024xf32>
    %19 = tpu.matmul %17, %18, %cst_13 {dimension_numbers = #tpu.dot_dimension_numbers<[1], [0], [0], [1], [0, 0, 1, 1], [], []>} : vector<2x32xbf16>, vector<32x1024xbf16>, vector<2x1024xf32> -> vector<2x1024xf32>
    %c0_14 = arith.constant 0 : index
    %c0_15 = arith.constant 0 : index
    %20 = vector.load %arg7[%c0_14, %c0_15] : memref<1x1024xf32, #tpu.memory_space<vmem>>, vector<1x1024xf32>
    %21 = vector.broadcast %20 : vector<1x1024xf32> to vector<2x1024xf32>
    %22 = arith.addf %19, %21 : vector<2x1024xf32>
    %23 = arith.truncf %22 : vector<2x1024xf32> to vector<2x1024xbf16>
    %c0_16 = arith.constant 0 : index
    %c0_17 = arith.constant 0 : index
    %c0_18 = arith.constant 0 : index
    %24 = vector.load %arg9[%c0_16, %c0_17, %c0_18] : memref<1x2x1024xbf16, #tpu.memory_space<vmem>>, vector<1x2x1024xbf16>
    %25 = vector.shape_cast %24 : vector<1x2x1024xbf16> to vector<2x1024xbf16>
    %26 = vector.shape_cast %23 : vector<2x1024xbf16> to vector<1x2x1024xbf16>
    tpu.vector_store %arg9[%c0_16, %c0_17, %c0_18], %26 {strides = array<i32>} : memref<1x2x1024xbf16, #tpu.memory_space<vmem>>, vector<1x2x1024xbf16>,
    %27 = arith.subf %22, %0 : vector<2x1024xf32>
    %28 = arith.mulf %27, %27 : vector<2x1024xf32>
    %cst_19 = arith.constant dense<0.000000e+00> : vector<2xf32>
    %29 = vector.multi_reduction <add>, %28, %cst_19 [1] : vector<2x1024xf32> to vector<2xf32>
    %cst_20 = arith.constant dense<0.000000e+00> : vector<2xf32>
    %30 = vector.multi_reduction <add>, %10, %cst_20 [1] : vector<2x32xf32> to vector<2xf32>
    %cst_21 = arith.constant 0.000000e+00 : f32
    %31 = vector.broadcast %cst_21 : f32 to vector<2xf32>
    %32 = arith.subf %31, %30 : vector<2xf32>
    %cst_22 = arith.constant dense<0.000000e+00> : vector<2xf32>
    %33 = vector.multi_reduction <add>, %11, %cst_22 [1] : vector<2x32xf32> to vector<2xf32>
    %34 = arith.mulf %9, %9 : vector<2x32xf32>
    %cst_23 = arith.constant dense<0.000000e+00> : vector<2xf32>
    %35 = vector.multi_reduction <add>, %34, %cst_23 [1] : vector<2x32xf32> to vector<2xf32>
    %36 = math.sqrt %35 : vector<2xf32>
    %cst_24 = arith.constant 3.200000e+01 : f32
    %37 = vector.broadcast %cst_24 : f32 to vector<2xf32>
    %38 = arith.subf %32, %37 : vector<2xf32>
    %39 = arith.addf %38, %33 : vector<2xf32>
    %40 = arith.addf %39, %36 : vector<2xf32>
    %c0_25 = arith.constant 0 : index
    %c0_26 = arith.constant 0 : index
    %c0_27 = arith.constant 0 : index
    %41 = vector.load %arg10[%c0_25, %c0_26, %c0_27] : memref<1x1x2xf32, #tpu.memory_space<vmem>>, vector<1x1x2xf32>
    %42 = vector.shape_cast %41 : vector<1x1x2xf32> to vector<2xf32>
    %43 = vector.shape_cast %40 : vector<2xf32> to vector<1x1x2xf32>
    tpu.vector_store %arg10[%c0_25, %c0_26, %c0_27], %43 {strides = array<i32>} : memref<1x1x2xf32, #tpu.memory_space<vmem>>, vector<1x1x2xf32>,
    %c0_28 = arith.constant 0 : index
    %c0_29 = arith.constant 0 : index
    %c0_30 = arith.constant 0 : index
    %44 = vector.load %arg11[%c0_28, %c0_29, %c0_30] : memref<1x1x2xf32, #tpu.memory_space<vmem>>, vector<1x1x2xf32>
    %45 = vector.shape_cast %44 : vector<1x1x2xf32> to vector<2xf32>
    %46 = vector.shape_cast %29 : vector<2xf32> to vector<1x1x2xf32>
    tpu.vector_store %arg11[%c0_28, %c0_29, %c0_30], %46 {strides = array<i32>} : memref<1x1x2xf32, #tpu.memory_space<vmem>>, vector<1x1x2xf32>,
    return
  }
  func.func @transform_0(%arg0: i32, %arg1: i32) -> (i32, i32) {
    %c0_i32 = arith.constant 0 : i32
    %c0_i32_0 = arith.constant 0 : i32
    return %arg0, %c0_i32 : i32, i32
  }
  func.func @transform_1(%arg0: i32, %arg1: i32) -> (i32, i32, i32) {
    %c0_i32 = arith.constant 0 : i32
    %c0_i32_0 = arith.constant 0 : i32
    return %arg1, %arg0, %c0_i32 : i32, i32, i32
  }
  func.func @transform_2(%arg0: i32, %arg1: i32) -> (i32, i32) {
    %c0_i32 = arith.constant 0 : i32
    %c0_i32_0 = arith.constant 0 : i32
    %c0_i32_1 = arith.constant 0 : i32
    return %c0_i32, %c0_i32_0 : i32, i32
  }
  func.func @transform_3(%arg0: i32, %arg1: i32) -> (i32, i32) {
    %c0_i32 = arith.constant 0 : i32
    %c0_i32_0 = arith.constant 0 : i32
    %c0_i32_1 = arith.constant 0 : i32
    return %c0_i32, %c0_i32_0 : i32, i32
  }
  func.func @transform_4(%arg0: i32, %arg1: i32) -> (i32, i32) {
    %c0_i32 = arith.constant 0 : i32
    %c0_i32_0 = arith.constant 0 : i32
    %c0_i32_1 = arith.constant 0 : i32
    return %c0_i32, %c0_i32_0 : i32, i32
  }
  func.func @transform_5(%arg0: i32, %arg1: i32) -> (i32, i32) {
    %c0_i32 = arith.constant 0 : i32
    %c0_i32_0 = arith.constant 0 : i32
    %c0_i32_1 = arith.constant 0 : i32
    return %c0_i32, %c0_i32_0 : i32, i32
  }
  func.func @transform_6(%arg0: i32, %arg1: i32) -> (i32, i32, i32) {
    %c0_i32 = arith.constant 0 : i32
    %c0_i32_0 = arith.constant 0 : i32
    return %arg1, %arg0, %c0_i32 : i32, i32, i32
  }
  func.func @transform_7(%arg0: i32, %arg1: i32) -> (i32, i32, i32) {
    %c0_i32 = arith.constant 0 : i32
    %c0_i32_0 = arith.constant 0 : i32
    return %arg1, %arg0, %c0_i32 : i32, i32, i32
  }
  func.func @transform_8(%arg0: i32, %arg1: i32) -> (i32, i32, i32) {
    %c0_i32 = arith.constant 0 : i32
    %c0_i32_0 = arith.constant 0 : i32
    return %arg1, %c0_i32, %arg0 : i32, i32, i32
  }
  func.func @transform_9(%arg0: i32, %arg1: i32) -> (i32, i32, i32) {
    %c0_i32 = arith.constant 0 : i32
    %c0_i32_0 = arith.constant 0 : i32
    return %arg1, %c0_i32, %arg0 : i32, i32, i32
  }
}

</mosaic_0001>

<bundles_post_ra>
// kernel: vae_forward.1
= control target key start
LH: loop header
LB: loop body
LE: loop exit
PB: predicated region body
PF: predicated region fallthrough
CT: control target
= control target key end

     0   :  { %s2791_s0 = inlined_call_operand.vmem [shape: f32[2,1024], index: 0, kind: input, shape index: {}]   ;;  %s2792_s1 = inlined_call_operand.vmem [shape: f32[2,2,32], index: 1, kind: input, shape index: {}]   ;;  %s2793_s2 = inlined_call_operand.vmem [shape: bf16[1024,64], index: 2, kind: input, shape index: {}]   ;;  %s2794_s3 = inlined_call_operand.vmem [shape: f32[1,64], index: 3, kind: input, shape index: {}]   ;;  %s2795_s4 = inlined_call_operand.vmem [shape: bf16[32,1024], index: 4, kind: input, shape index: {}]   ;;  %s2796_s5 = inlined_call_operand.vmem [shape: f32[1,1024], index: 5, kind: input, shape index: {}]   ;;  %s2797_s6 = inlined_call_operand.hbm [shape: f32[2,2,32], index: 6, kind: output, shape index: {0}]   ;;  %s2798_s7 = inlined_call_operand.vmem [shape: bf16[2,2,1024], index: 7, kind: output, shape index: {1}]   ;;  %s2799_s8 = inlined_call_operand.vmem [shape: f32[2,1,2], index: 8, kind: output, shape index: {2}]   ;;  %s2800_s9 = inlined_call_operand.vmem [shape: f32[2,1,2], index: 9, kind: output, shape index: {3}]  }
   0x1   :  { %2803 = sst [smem:[#allocation7_spill]] %s2791_s0 }
   0x2   :  { %15 = vsyncpa [#allocation3], 0 }
   0x3   :  { %17 = vsyncpa [#allocation3 + $0x1], 0  ;;  %s2310_s30 = smov 0   ;;  %s2312_s10 = smov 0  }
   0x4   :  { %s2314_s11 = smov 0   ;;  %s2316_s12 = smov 0  }
   0x5   :  { %s2318_s13 = smov 0   ;;  %s2320_s14 = smov 0  }
   0x6 LB: > { %2804 = sst [smem:[#allocation5_spill]] %s2248_s13  ;;  %s1853_s15 = sadd.s32 4294967295, %s2252_s14   ;;  %s2252_s14 = sphi %s2320_s14, %s23_s14   ;;  %s2248_s13 = sphi %s2318_s13, %s2810_s13   ;;  %s2244_s12 = sphi %s2316_s12, %s2809_s12   ;;  %s2240_s11 = sphi %s2314_s11, %s2813_s11   ;;  %s2236_s10 = sphi %s2312_s10, %s2812_s10   ;;  %s2232_s30 = sphi %s2310_s30, %s2811_s30  }
   0x7   : > { %s1854_s16 = sadd.s32 4294967294, %s2252_s14   ;;  %s32_s17 = sadd.s32 1, %s2248_s13 }
   0x8   : > { %s182_s18 = sadd.s32 1, %s2240_s11  ;;  %p33_p0 = scmp.ge.s32.totalorder %s32_s17, 2 }
   0x9   : > { %p192_p1 = scmp.ne.s32.totalorder %s2240_s11, %s2236_s10  ;;  %p193_p2 = scmp.eq.s32.totalorder %s1853_s15, 1 }
   0xa   : > { %p198_p3 = scmp.ne.s32.totalorder %s2236_s10, %s2232_s30  ;;  %s2815_s17 = smov (%p33_p0, %s32_s17), 0 }
   0xb   : > { %2805 = sst [smem:[#allocation6_spill]] %s2815_s17  ;;  %p2350_p4 = por %p193_p2, %p192_p1 }
   0xc   : > { %p199_p5 = scmp.eq.s32.totalorder %s1854_s16, 1  ;;  %s177_s20 = ssub.s32 %s2248_s13, %s2815_s17 }
   0xd   : > { %p1858_p6 = scmp.ge.s32.totalorder %s2252_s14, 1  ;;  %p180_p7 = scmp.eq.s32.totalorder %s177_s20, 0 }
   0xe   : > { %p2357_p8 = por %p199_p5, %p198_p3  ;;  %p331_p9 = scmp.lt.s32.totalorder %s2252_s14, 3 }
   0xf   : > { %s2363_s22 = scalar_select %p180_p7, %s2240_s11, %s182_s18  }
  0x10   : > { %p332_p10 = pnand %p1858_p6, %p331_p9 }
  0x11   : > { %v2104_v0 = vld [vmem:[%s2793_s2 + $0x40] sm:$0xff] (!%p332_p10)   ;;  %v2108_v4 = vld [vmem:[%s2793_s2 + $0x48] sm:$0xff] (!%p332_p10)   ;;  %v2112_v8 = vld [vmem:[%s2793_s2 + $0x50] sm:$0xff] (!%p332_p10)   ;;  %v435_v28 = vlaneseq (!%p332_p10)  ;;  %s2808_s0 = sld [smem:[#allocation7_spill]] (!%p332_p10)  ;;  %v2254_v36 = vmov (!%p332_p10), 1983009808  }
  0x12   : > { %335 = sbr.rel (%p332_p10) target bundleno = 916 (0x394), region = 44  ;;  %v2105_v1 = vld [vmem:[%s2793_s2 + $0xc0] sm:$0xff] (!%p332_p10)   ;;  %1956 = vmatprep.subr.bf16.mxu0 (!%p332_p10), %v2104_v0  ;;  %v2109_v5 = vld [vmem:[%s2793_s2 + $0xc8] sm:$0xff] (!%p332_p10)   ;;  %v2113_v9 = vld [vmem:[%s2793_s2 + $0xd0] sm:$0xff] (!%p332_p10)   ;;  %v433_v37 = vunpack.c.l.s4 (!%p332_p10), %v2254_v36  ;;  %p399_p11 = scmp.lt.s32.totalorder (!%p332_p10), %s2244_s12, 1  ;;  %vm1177_vm0 = vcmask (!%p332_p10), 254976  }
  0x13   : > { %v2106_v2 = vld [vmem:[%s2793_s2] sm:$0xff] (!%p332_p10)   ;;  %1978 = vmatprep.subr.bf16.mxu1 (!%p332_p10), %v2105_v1  ;;  %v2110_v6 = vld [vmem:[%s2793_s2 + $0x8] sm:$0xff] (!%p332_p10)   ;;  %v2114_v10 = vld [vmem:[%s2793_s2 + $0x10] sm:$0xff] (!%p332_p10)   ;;  %v2462_v33 = vshrl.u32 (!%p332_p10), %v435_v28, 7  ;;  %s2255_s13 = smov (!%p332_p10), 32   ;;  %s2256_s29 = smov (!%p332_p10), 96  }
  0x14   : > { %v2107_v3 = vld [vmem:[%s2793_s2 + $0x80] sm:$0xff] (!%p332_p10)   ;;  %1957 = vmatpush3.bf16.msra.mxu0 (!%p332_p10), %v2106_v2  ;;  %v2111_v7 = vld [vmem:[%s2793_s2 + $0x88] sm:$0xff] (!%p332_p10)   ;;  %v2115_v11 = vld [vmem:[%s2793_s2 + $0x90] sm:$0xff] (!%p332_p10)   ;;  %v434_v39 = vunpack.c.0.s8 (!%p332_p10), %v433_v37  ;;  %vm1321_vm1 = vcmask (!%p332_p10), 261120   ;;  %s365_s28 = sand.u32 (!%p332_p10), 1, %s2236_s10   ;;  %vm1626_vm4 = vcmask (!%p332_p10), 8192  }
  0x15   : > { %1979 = vmatpush3.bf16.msra.mxu1 (!%p332_p10), %v2107_v3  ;;  %1958 = vmatprep.subr.bf16.mxu0 (!%p332_p10), %v2108_v4  ;;  %v2116_v12 = vld [vmem:[%s2793_s2 + $0x58] sm:$0xff] (!%p332_p10)   ;;  %v2120_v16 = vld [vmem:[%s2793_s2 + $0x60] sm:$0xff] (!%p332_p10)   ;;  %v2124_v20 = vld [vmem:[%s2793_s2 + $0x68] sm:$0xff] (!%p332_p10)   ;;  %vm1572_vm5 = vcmask (!%p332_p10), 1041408   ;;  %s2259_s17 = smov (!%p332_p10), [#allocation2]  }
  0x16   : > { %1980 = vmatprep.subr.bf16.mxu1 (!%p332_p10), %v2109_v5  ;;  %v2117_v13 = vld [vmem:[%s2793_s2 + $0xd8] sm:$0xff] (!%p332_p10)   ;;  %v2121_v17 = vld [vmem:[%s2793_s2 + $0xe0] sm:$0xff] (!%p332_p10)   ;;  %v2125_v21 = vld [vmem:[%s2793_s2 + $0xe8] sm:$0xff] (!%p332_p10)   ;;  %v2474_v41 = vsub.s32 (!%p332_p10), %v434_v39, %v2462_v33 }
  0x17   : > { %v2118_v14 = vld [vmem:[%s2793_s2 + $0x18] sm:$0xff] (!%p332_p10)   ;;  %v2122_v18 = vld [vmem:[%s2793_s2 + $0x20] sm:$0xff] (!%p332_p10)   ;;  %v2126_v22 = vld [vmem:[%s2793_s2 + $0x28] sm:$0xff] (!%p332_p10)  }
  0x18   : > { %1959 = vmatpush3.bf16.msra.mxu0 (!%p332_p10), %v2110_v6  ;;  %v2119_v15 = vld [vmem:[%s2793_s2 + $0x98] sm:$0xff] (!%p332_p10)   ;;  %v2123_v19 = vld [vmem:[%s2793_s2 + $0xa0] sm:$0xff] (!%p332_p10)   ;;  %v2127_v23 = vld [vmem:[%s2793_s2 + $0xa8] sm:$0xff] (!%p332_p10)  }
  0x19   : > { %1981 = vmatpush3.bf16.msra.mxu1 %v2111_v7  ;;  %1960 = vmatprep.subr.bf16.mxu0 %v2112_v8  ;;  %v2128_v24 = vld [vmem:[%s2793_s2 + $0x70] sm:$0xff]   ;;  %v2132_v29 = vld [vmem:[%s2793_s2 + $0x78] sm:$0xff]   ;;  %v427_v34 = vld [vmem:[%s2808_s0] sm:$0xff]  ;;  %s2542_s20 = scalar_select %p399_p11, %s2244_s12, 1 }
  0x1a   : > { %1982 = vmatprep.subr.bf16.mxu1 %v2113_v9  ;;  %v2129_v25 = vld [vmem:[%s2793_s2 + $0xf0] sm:$0xff]   ;;  %v2133_v30 = vld [vmem:[%s2793_s2 + $0xf8] sm:$0xff]   ;;  %v2137_v35 = vld [vmem:[%s2793_s2 + $0x140] sm:$0xff]   ;;  %v431_v40 = vcombine.high %v427_v34, %v427_v34  ;;  %v2477_v42 = vrot.slane %v427_v34, %v2474_v41 }
  0x1b   : > { %v2130_v26 = vld [vmem:[%s2793_s2 + $0x30] sm:$0xff]   ;;  %v2134_v31 = vld [vmem:[%s2793_s2 + $0x38] sm:$0xff]   ;;  %v2138_v38 = vld [vmem:[%s2793_s2 + $0x1c0] sm:$0xff]   ;;  %s1860_s16 = sshll.u32 %s2542_s20, 1  ;;  %s419_s23 = scalar_lea.vmem %s2799_s8, %s2542_s20 }
  0x1c   : > { %1961 = vmatpush3.bf16.msra.mxu0 %v2114_v10  ;;  %v2131_v27 = vld [vmem:[%s2793_s2 + $0xb0] sm:$0xff]   ;;  %v2135_v32 = vld [vmem:[%s2793_s2 + $0xb8] sm:$0xff]   ;;  %v2480_v43 = vrot.slane %v431_v40, %v2474_v41  ;;  %v2484_v44 = vcombine.high %v2477_v42, %v2477_v42  ;;  %v2139_v46 = vld [vmem:[%s2793_s2 + $0x100] sm:$0xff]   ;;  %v473_v47 = vpack.c.bf16 %v2477_v42, %v2477_v42  ;;  %s405_s15 = scalar_lea.vmem %s2792_s1, %s1860_s16 }
  0x1d   : > { %1983 = vmatpush3.bf16.msra.mxu1 %v2115_v11  ;;  %1962 = vmatprep.subr.bf16.mxu0 %v2116_v12  ;;  %v2140_v49 = vld [vmem:[%s2793_s2 + $0x180] sm:$0xff]   ;;  %v2141_v52 = vld [vmem:[%s2793_s2 + $0x148] sm:$0xff]   ;;  %v2145_v56 = vld [vmem:[%s2793_s2 + $0x150] sm:$0xff]  }
  0x1e   : > { %1984 = vmatprep.subr.bf16.mxu1 %v2117_v13  ;;  %v2488_v45 = vcombine.high %v2480_v43, %v2480_v43  ;;  %v475_v48 = vpack.c.bf16 %v2480_v43, %v2480_v43  ;;  %v474_v50 = vpack.c.bf16 %v2484_v44, %v2484_v44  ;;  %v2142_v53 = vld [vmem:[%s2793_s2 + $0x1c8] sm:$0xff]   ;;  %v2146_v57 = vld [vmem:[%s2793_s2 + $0x1d0] sm:$0xff]   ;;  %v2149_v60 = vld [vmem:[%s2793_s2 + $0x158] sm:$0xff]  }
  0x1f   : > { %v2143_v54 = vld [vmem:[%s2793_s2 + $0x108] sm:$0xff]   ;;  %v2147_v58 = vld [vmem:[%s2793_s2 + $0x110] sm:$0xff]   ;;  %v2150_v61 = vld [vmem:[%s2793_s2 + $0x1d8] sm:$0xff]  }
  0x20   : > { %1963 = vmatpush3.bf16.msra.mxu0 %v2118_v14  ;;  %v476_v51 = vpack.c.bf16 %v2488_v45, %v2488_v45  ;;  %1033 = vmatprep.mubr.bf16.mxu0 %v474_v50  ;;  %v2144_v55 = vld [vmem:[%s2793_s2 + $0x188] sm:$0xff]   ;;  %v2148_v59 = vld [vmem:[%s2793_s2 + $0x190] sm:$0xff]   ;;  %v2151_v62 = vld [vmem:[%s2793_s2 + $0x118] sm:$0xff]  }
  0x21   : > { %1985 = vmatpush3.bf16.msra.mxu1 %v2119_v15  ;;  %1964 = vmatprep.subr.bf16.mxu0 %v2120_v16  ;;  %v2152_v63 = vld [vmem:[%s2793_s2 + $0x198] sm:$0xff]   ;;  %v2153_v0 = vld [vmem:[%s2793_s2 + $0x160] sm:$0xff]   ;;  %v2157_v4 = vld [vmem:[%s2793_s2 + $0x168] sm:$0xff]  }
  0x22   : > { %1986 = vmatprep.subr.bf16.mxu1 %v2121_v17  ;;  %1073 = vmatprep.mubr.bf16.mxu1 %v476_v51  ;;  %v2154_v1 = vld [vmem:[%s2793_s2 + $0x1e0] sm:$0xff]   ;;  %v2158_v5 = vld [vmem:[%s2793_s2 + $0x1e8] sm:$0xff]   ;;  %v2161_v8 = vld [vmem:[%s2793_s2 + $0x170] sm:$0xff]  }
  0x23   : > { %v2155_v2 = vld [vmem:[%s2793_s2 + $0x120] sm:$0xff]   ;;  %v2159_v6 = vld [vmem:[%s2793_s2 + $0x128] sm:$0xff]   ;;  %v2162_v9 = vld [vmem:[%s2793_s2 + $0x1f0] sm:$0xff]  }
  0x24   : > { %1965 = vmatpush3.bf16.msra.mxu0 %v2122_v18  ;;  %v2156_v3 = vld [vmem:[%s2793_s2 + $0x1a0] sm:$0xff]   ;;  %v2160_v7 = vld [vmem:[%s2793_s2 + $0x1a8] sm:$0xff]   ;;  %v2163_v14 = vld [vmem:[%s2793_s2 + $0x130] sm:$0xff]  }
  0x25   : > { %1987 = vmatpush3.bf16.msra.mxu1 %v2123_v19  ;;  %1966 = vmatprep.subr.bf16.mxu0 %v2124_v20  ;;  %v428_v10 = vld [vmem:[%s2808_s0 + $0x8] sm:$0xff]  ;;  %v481_v11 = vld [vmem:[%s405_s15] sm:$0x3]  ;;  %v2164_v15 = vld [vmem:[%s2793_s2 + $0x1b0] sm:$0xff]   ;;  %s2689_s15 = sshll.u32 %s365_s28, 1 }
  0x26   : > { %1988 = vmatprep.subr.bf16.mxu1 %v2125_v21  ;;  %v2582_v12 = vrot.slane %v428_v10, %v2474_v41  ;;  %v448_v13 = vcombine.high %v428_v10, %v428_v10  ;;  %1164 = vrot.lane.b32.xlu0 %v481_v11, %s2255_s13  ;;  %v2165_v18 = vld [vmem:[%s2793_s2 + $0x178] sm:$0xff]   ;;  %v1182_v10 = vld [vmem:[%s2795_s4 + $0x10] sm:$0xff]  ;;  %s367_s24 = scalar_lea.vmem [#allocation2], %s2689_s15 }
  0x27   : > { %v2166_v19 = vld [vmem:[%s2793_s2 + $0x1f8] sm:$0xff]   ;;  %s1670_s18 = sshll.u32 %s367_s24, 4  ;;  %s1671_s18 = int_to_ptr.vmem [resolvable:$true] %s1670_s18 }
  0x28   : > { %1967 = vmatpush3.bf16.msra.mxu0 %v2126_v22  ;;  %v2593_v16 = vcombine.high %v2582_v12, %v2582_v12  ;;  %v2596_v17 = vrot.slane %v448_v13, %v2474_v41  ;;  %v2167_v22 = vld [vmem:[%s2793_s2 + $0x138] sm:$0xff]   ;;  %v1186_v13 = vld [vmem:[%s2795_s4 + $0x30] sm:$0xff]  ;;  %s2174_s27 = scalar_lea.vmem %s1671_s18, 32 }
  0x29   : > { %1989 = vmatpush3.bf16.msra.mxu1 %v2127_v23  ;;  %1968 = vmatprep.subr.bf16.mxu0 %v2128_v24  ;;  %v2168_v23 = vld [vmem:[%s2793_s2 + $0x1b8] sm:$0xff]   ;;  %p2175_p12 = scmp.ne.s32.totalorder %s1671_s18, %s2174_s27 }
  0x2a   : > { %1990 = vmatprep.subr.bf16.mxu1 %v2129_v25  ;;  %v478_v20 = vpack.c.bf16 %v2593_v16, %v2593_v16  ;;  %v2608_v21 = vcombine.high %v2596_v17, %v2596_v17  ;;  %v477_v25 = vpack.c.bf16 %v2582_v12, %v2582_v12 }
  0x2b   : > { %p2176_p13 = pnand %p2175_p12, %p2350_p4 }
  0x2c   : > { %1969 = vmatpush3.bf16.msra.mxu0 %v2130_v26  ;;  %v480_v24 = vpack.c.bf16 %v2608_v21, %v2608_v21  ;;  %v479_v26 = vpack.c.bf16 %v2596_v17, %v2596_v17 }
  0x2d   : > { %1991 = vmatpush3.bf16.msra.mxu1 %v2131_v27  ;;  %1970 = vmatprep.subr.bf16.mxu0 %v2132_v29  ;;  %p2177_p0 = pneg %p2176_p13 }
  0x2e   : > { %1992 = vmatprep.subr.bf16.mxu1 %v2133_v30  ;;  %v1862_v30 = vld [vmem:[%s2794_s3] ss:$0 sm:$0xff] }
  0x30   : > { %1971 = vmatpush3.bf16.msra.mxu0 %v2134_v31 }
  0x31   : > { %1993 = vmatpush3.bf16.msra.mxu1 %v2135_v32  ;;  %2000 = vmatprep.subr.bf16.mxu0 %v2137_v35 }
  0x32   : > { %2022 = vmatprep.subr.bf16.mxu1 %v2138_v38 }
  0x33   : > { %1034 = vmatmul.mubr.bf16.vlgmr.msra.gmra.mrb[0].mxu0 %v473_v47 }
  0x34   : > { %1074 = vmatmul.mubr.bf16.vlgmr.msra.gmra.mrb[0].mxu1 %v475_v48  ;;  %2001 = vmatpush3.bf16.msra.mxu0 %v2139_v46 }
  0x35   : > { %2023 = vmatpush3.bf16.msra.mxu1 %v2140_v49  ;;  %2002 = vmatprep.subr.bf16.mxu0 %v2141_v52 }
  0x36   : > { %2024 = vmatprep.subr.bf16.mxu1 %v2142_v53  ;;  %1113 = vmatprep.mubr.bf16.mxu0 %v478_v20  ;;  %v1183_v20 = vld [vmem:[%s2795_s4 + $0x18] sm:$0xff] }
  0x37   : > { %1153 = vmatprep.mubr.bf16.mxu1 %v480_v24 }
  0x38   : > { %2003 = vmatpush3.bf16.msra.mxu0 %v2143_v54 }
  0x39   : > { %2025 = vmatpush3.bf16.msra.mxu1 %v2144_v55  ;;  %2004 = vmatprep.subr.bf16.mxu0 %v2145_v56 }
  0x3a   : > { %2026 = vmatprep.subr.bf16.mxu1 %v2146_v57 }
  0x3c   : > { %2005 = vmatpush3.bf16.msra.mxu0 %v2147_v58 }
  0x3d   : > { %2027 = vmatpush3.bf16.msra.mxu1 %v2148_v59  ;;  %2006 = vmatprep.subr.bf16.mxu0 %v2149_v60  ;;  %v1180_v60 = vld [vmem:[%s2795_s4] sm:$0xff] }
  0x3e   : > { %2028 = vmatprep.subr.bf16.mxu1 %v2150_v61  ;;  %v1184_v61 = vld [vmem:[%s2795_s4 + $0x20] sm:$0xff] }
  0x40   : > { %2007 = vmatpush3.bf16.msra.mxu0 %v2151_v62  ;;  %v1181_v62 = vld [vmem:[%s2795_s4 + $0x8] sm:$0xff] }
  0x41   : > { %2029 = vmatpush3.bf16.msra.mxu1 %v2152_v63  ;;  %2008 = vmatprep.subr.bf16.mxu0 %v2153_v0  ;;  %v1927_v63 = vcombine.low %v1180_v60, %v1184_v61  ;;  %v1928_v0 = vcombine.high %v1180_v60, %v1184_v61 }
  0x42   : > { %2030 = vmatprep.subr.bf16.mxu1 %v2154_v1  ;;  %v1185_v1 = vld [vmem:[%s2795_s4 + $0x28] sm:$0xff] }
  0x44   : > { %2009 = vmatpush3.bf16.msra.mxu0 %v2155_v2  ;;  %v1188_v2 = vld [vmem:[%s2795_s4 + $0x40] sm:$0xff] }
  0x45   : > { %2031 = vmatpush3.bf16.msra.mxu1 %v2156_v3  ;;  %2010 = vmatprep.subr.bf16.mxu0 %v2157_v4  ;;  %v1192_v3 = vld [vmem:[%s2795_s4 + $0x60] sm:$0xff]  ;;  %v2257_v4 = vmov 0  }
  0x46   : > { %2032 = vmatprep.subr.bf16.mxu1 %v2158_v5  ;;  %v1929_v5 = vcombine.low %v1181_v62, %v1185_v1 }
  0x48   : > { %2011 = vmatpush3.bf16.msra.mxu0 %v2159_v6  ;;  %v1930_v6 = vcombine.high %v1181_v62, %v1185_v1 }
  0x49   : > { %2033 = vmatpush3.bf16.msra.mxu1 %v2160_v7  ;;  %2012 = vmatprep.subr.bf16.mxu0 %v2161_v8  ;;  %v1936_v7 = vcombine.high %v1188_v2, %v1192_v3  ;;  %v1189_v8 = vld [vmem:[%s2795_s4 + $0x48] sm:$0xff] }
  0x4a   : > { %2034 = vmatprep.subr.bf16.mxu1 %v2162_v9  ;;  %v1193_v9 = vld [vmem:[%s2795_s4 + $0x68] sm:$0xff] }
  0x4b   : > { %v1938_v11 = vcombine.high %v1189_v8, %v1193_v9 }
  0x4c   : > { %2013 = vmatpush3.bf16.msra.mxu0 %v2163_v14  ;;  %v1935_v14 = vcombine.low %v1188_v2, %v1192_v3  ;;  %v1200_v2 = vsub.s32 0, %v2462_v33  ;;  %v1208_v3 = vsub.s32 2, %v2462_v33 }
  0x4d   : > { %2035 = vmatpush3.bf16.msra.mxu1 %v2164_v15  ;;  %2014 = vmatprep.subr.bf16.mxu0 %v2165_v18  ;;  %v1931_v15 = vcombine.low %v1182_v10, %v1186_v13  ;;  %v1937_v18 = vcombine.low %v1189_v8, %v1193_v9  ;;  %v1212_v8 = vsub.s32 3, %v2462_v33 }
  0x4e   : > { %2036 = vmatprep.subr.bf16.mxu1 %v2166_v19  ;;  %v1932_v19 = vcombine.high %v1182_v10, %v1186_v13 }
  0x50   : > { %2015 = vmatpush3.bf16.msra.mxu0 %v2167_v22  ;;  %v1187_v22 = vld [vmem:[%s2795_s4 + $0x38] sm:$0xff] }
  0x51   : > { %2037 = vmatpush3.bf16.msra.mxu1 %v2168_v23  ;;  %1325 = vmatprep.subr.bf16.mxu0 %v1928_v0  ;;  %v1934_v23 = vcombine.high %v1183_v20, %v1187_v22  ;;  %v1933_v24 = vcombine.low %v1183_v20, %v1187_v22  ;;  %v1224_v20 = vsub.s32 6, %v2462_v33 }
  0x52   : > { %1366 = vmatprep.subr.bf16.mxu1 %v1930_v6  ;;  %v2258_v6 = vmov 1966171168  }
  0x53   : > { %1114 = vmatmul.mubr.bf16.vlgmr.msra.gmra.mrb[4].mxu0 %v477_v25 }
  0x54   : > { %1154 = vmatmul.mubr.bf16.vlgmr.msra.gmra.mrb[4].mxu1 %v479_v26  ;;  %1357 = vmatprep.mubr.bf16.mxu0 %v2257_v4 }
  0x55   : > { %1398 = vmatprep.mubr.bf16.mxu1 %v2257_v4  ;;  %1326 = vmatpush1.bf16.msra.mxu0 %v1927_v63 }
  0x56   : > { %1367 = vmatpush1.bf16.msra.mxu1 %v1929_v5  ;;  %1327 = vmatprep.subr.bf16.mxu0 %v1936_v7  ;;  %v1204_v5 = vsub.s32 1, %v2462_v33  ;;  %v1510_v7 = vunpack.c.l.s4 %v2258_v6 }
  0x57   : > { %1368 = vmatprep.subr.bf16.mxu1 %v1938_v11 }
  0x58   : > { %v1511_v13 = vunpack.c.0.s8 %v1510_v7 }
  0x59   : > { %1328 = vmatpush1.bf16.msra.mxu0 %v1935_v14 }
  0x5a   : > { %1369 = vmatpush1.bf16.msra.mxu1 %v1937_v18  ;;  %1407 = vmatprep.subr.bf16.mxu0 %v1932_v19 }
  0x5b   : > { %1448 = vmatprep.subr.bf16.mxu1 %v1934_v23 }
  0x98   : > { %v1165_v25 = vpop.permute.xlu0 %1164 }
 0x106   : > { %v1972_v27 = vpop.f32.mrb[0].mxu0 }
 0x107   : > { %v1994_v29 = vpop.f32.mrb[0].mxu1  ;;  %v1973_v31 = vpop.f32.mrb[1].mxu0 }
 0x108   : > { %v1995_v32 = vpop.f32.mrb[1].mxu1  ;;  %v1974_v34 = vadd.f32 %v1973_v31, %v1972_v27  ;;  %v1975_v36 = vpop.f32.mrb[2].mxu0 }
 0x109   : > { %v1996_v35 = vadd.f32 %v1995_v32, %v1994_v29  ;;  %v1997_v37 = vpop.f32.mrb[2].mxu1  ;;  %v1976_v38 = vpop.f32.mrb[3].mxu0  ;;  %v1191_v36 = vld [vmem:[%s2795_s4 + $0x58] sm:$0xff] }
 0x10a   : > { %v1998_v39 = vpop.f32.mrb[3].mxu1  ;;  %v1036_v40 = vadd.f32 %v1974_v34, %v1862_v30  ;;  %v1190_v34 = vld [vmem:[%s2795_s4 + $0x50] sm:$0xff]  ;;  %v1195_v37 = vld [vmem:[%s2795_s4 + $0x78] sm:$0xff] }
 0x10b   : > { %v1942_v39 = vcombine.high %v1191_v36, %v1195_v37 }
 0x10c   : > { %v1076_v41 = vadd.f32 %v1996_v35, %v1036_v40  ;;  %v1194_v35 = vld [vmem:[%s2795_s4 + $0x70] sm:$0xff] }
 0x10d   : > { %v1940_v38 = vcombine.high %v1190_v34, %v1194_v35 }
 0x126   : > { %v2016_v46 = vpop.f32.mrb[4].mxu0 }
 0x127   : > { %v2038_v47 = vpop.f32.mrb[4].mxu1  ;;  %v2017_v48 = vpop.f32.mrb[5].mxu0 }
 0x128   : > { %v2039_v49 = vpop.f32.mrb[5].mxu1  ;;  %v2018_v50 = vadd.f32 %v2017_v48, %v2016_v46  ;;  %v2019_v52 = vpop.f32.mrb[6].mxu0  ;;  %v1941_v46 = vcombine.low %v1191_v36, %v1195_v37 }
 0x129   : > { %v2040_v51 = vadd.f32 %v2039_v49, %v2038_v47  ;;  %v2041_v53 = vpop.f32.mrb[6].mxu1  ;;  %v2020_v54 = vpop.f32.mrb[7].mxu0 }
 0x12a   : > { %v2042_v55 = vpop.f32.mrb[7].mxu1  ;;  %v1116_v56 = vadd.f32 %v2018_v50, %v1076_v41  ;;  %v1939_v41 = vcombine.low %v1190_v34, %v1194_v35 }
 0x12c   : > { %v1156_v57 = vadd.f32 %v2040_v51, %v1116_v56  ;;  %v1620_v56 = vand.u32 127, %v435_v28 }
 0x12e   : > { %v1161_v58 = vmul.f32 1.442695, %v1156_v57  ;;  %1169 = vrot.lane.b32.xlu0 %v1156_v57, %s2255_s13  ;;  %v1604_v31 = vmul.f32 %v1156_v57, %v1156_v57  ;;  %v2692_v62 = vsub.s32 %v1620_v56, %v2462_v33  ;;  %s1861_s13 = sshll.u32 %s2542_s20, 3 }
 0x12f   : > { %s413_s16 = scalar_lea.vmem %s2798_s7, %s1861_s13  ;;  %s1636_s13 = scalar_lea.sflag [#allocation3], %s365_s28 }
 0x130   : > { %2170 = vpow2.f32 %v1161_v58  ;;  %v1605_v32 = vsel %vm1177_vm0, %v1604_v31, 0.0 }
 0x13a   : > { %v2171_v59 = vpop.eup %2170 }
 0x13b   : > { %1598 = vrot.lane.b32.xlu0 %v2171_v59, %s2256_s29  ;;  %v1167_v26 = vmul.f32 %v2171_v59, %v1165_v25 }
 0x1a0   : > { %v1170_v27 = vpop.permute.xlu0 %1169 }
 0x1a1   : > { %v1172_v29 = vadd.f32 %v1170_v27, %v1167_v26  ;;  %v1220_v26 = vsub.s32 5, %v2462_v33  ;;  %v1228_v27 = vsub.s32 7, %v2462_v33 }
 0x1a3   : > { %v1179_v30 = vpack.c.bf16 %v1172_v29, %v1172_v29 }
 0x1a5   : > { %1239 = vrot.lane.b32.xlu1 %v1179_v30, %s2256_s29  ;;  %v1514_v30 = vsub.s32 %v1511_v13, %v2462_v33 }
 0x1a9   : > { %1590 = vrot.lane.b32.xlu1 %v1156_v57, %s2256_s29 }
 0x1ad   : > { %v1599_v49 = vpop.permute.xlu0 %1598 }
 0x1ae   : > { %v1601_v50 = vsel %vm1177_vm0, %v1599_v49, 0.0 }
 0x1cd   : > { %1606 = vadd.xlane.f32.xlu1 %v1605_v32 }
 0x217   : > { %v1240_v40 = vpop.permute.xlu1 %1239 }
 0x218   : > { %1943 = vmatmul.mubr.msk.bf16.vlgmr.msra.gmra.mrb[8].mxu0 %vm1321_vm1, %v1240_v40  ;;  %1944 = vmatmul.mubr.msk.bf16.vlgmr.msra.gmra.mrb[8].mxu1 %vm1321_vm1, %v1240_v40 }
 0x219   : > { %1408 = vmatpush1.bf16.msra.mxu0 %v1931_v15  ;;  %1449 = vmatpush1.bf16.msra.mxu1 %v1933_v24  ;;  %v1216_v15 = vsub.s32 4, %v2462_v33 }
 0x21a   : > { %1409 = vmatprep.subr.bf16.mxu0 %v1940_v38  ;;  %1450 = vmatprep.subr.bf16.mxu1 %v1942_v39 }
 0x21b   : > { %v1591_v47 = vpop.permute.xlu1 %1590  ;;  %1439 = vmatprep.mubr.bf16.mxu0 %v2257_v4  ;;  %1480 = vmatprep.mubr.bf16.mxu1 %v2257_v4  ;;  %v1196_v4 = vld [vmem:[%s2796_s5] sm:$0xff] }
 0x21c   : > { %v1593_v48 = vsel %vm1177_vm0, %v1591_v47, 0.0  ;;  %v1201_v9 = vrot.slane %v1196_v4, %v1200_v2  ;;  %v1209_v10 = vrot.slane %v1196_v4, %v1208_v3  ;;  %v1205_v11 = vrot.slane %v1196_v4, %v1204_v5 }
 0x21d   : > { %1410 = vmatpush1.bf16.msra.mxu0 %v1939_v41  ;;  %1451 = vmatpush1.bf16.msra.mxu1 %v1941_v46  ;;  %v1213_v14 = vrot.slane %v1196_v4, %v1212_v8  ;;  %v1217_v39 = vrot.slane %v1196_v4, %v1216_v15  ;;  %v1225_v49 = vrot.slane %v1196_v4, %v1224_v20 }
 0x21e   : > { %1594 = vadd.xlane.f32.xlu0 %v1593_v48  ;;  %v1221_v33 = vrot.slane %v1196_v4, %v1220_v26 }
 0x220   : > { %1945 = vmatmul.mubr.msk.bf16.vlgmr.msra.gmra.mrb[12].mxu0 %vm1321_vm1, %v1240_v40  ;;  %1946 = vmatmul.mubr.msk.bf16.vlgmr.msra.gmra.mrb[12].mxu1 %vm1321_vm1, %v1240_v40 }
 0x222   : > { %1602 = vadd.xlane.f32.xlu0 %v1601_v50  ;;  %v1229_v50 = vrot.slane %v1196_v4, %v1228_v27 }
 0x238   : > { %1174 = vrot.lane.b32.xlu0 %v1172_v29, %s2256_s29  ;;  %s1953_s29 = sshll.u32 %s2244_s12, 5 }
 0x239   : > { %s2742_s26 = scalar_lea.hbm %s2797_s6, %s1953_s29 }
 0x25a   : > { %v1607_v51 = vpop.xlane.xlu1 %1606 }
 0x25b   : > { %2172 = vrsqrt.f32 %v1607_v51  ;;  %vm1610_vm2 = vcmp.eq.f32.partialorder %v1607_v51, inf  ;;  %v1613_v59 = vand.u32 2147483648, %v1607_v51  ;;  %vm1612_vm3 = vcmp.eq.f32.partialorder %v1607_v51, 0.0 }
 0x265   : > { %v2173_v52 = vpop.eup %2172 }
 0x266   : > { %v1609_v53 = vmul.f32 %v2173_v52, %v1607_v51 }
 0x268   : > { %v1611_v58 = vsel %vm1610_vm2, %v1607_v51, %v1609_v53 }
 0x269   : > { %v1614_v63 = vsel %vm1612_vm3, %v1613_v59, %v1611_v58 }
 0x2ab   : > { %v1595_v54 = vpop.xlane.xlu0 %1594 }
 0x2ac   : > { %v1596_v55 = vsub.f32 0.0, %v1595_v54 }
 0x2ae   : > { %v1951_v57 = vadd.f32 -32.0, %v1596_v55 }
 0x2af   : > { %v1603_v60 = vpop.xlane.xlu0 %1602 }
 0x2b0   : > { %v1616_v61 = vadd.f32 %v1951_v57, %v1603_v60 }
 0x2b2   : > { %v1617_v0 = vadd.f32 %v1616_v61, %v1614_v63 }
 0x2b3   : > { %v1175_v1 = vpop.permute.xlu0 %1174 }
 0x2b4   : > { %1178 = vst.msk [vmem:[%s367_s24] sm:$0x3] %vm1177_vm0, %v1175_v1  ;;  %v1624_v28 = vrot.slane %v1617_v0, %v2692_v62 }
 0x2b6   : > { %1627 = vst.msk [vmem:[%s419_s23] sm:$0x1] %vm1626_vm4, %v1624_v28 }
 0x2eb   : > { %v1359_v18 = vpop.f32.mrb[8].mxu0  ;;  %v1400_v19 = vpop.f32.mrb[8].mxu1 }
 0x2ec   : > { %v1360_v22 = vadd.f32 %v1359_v18, %v1201_v9  ;;  %v1401_v23 = vadd.f32 %v1400_v19, %v1209_v10  ;;  %v1361_v24 = vpop.f32.mrb[9].mxu0  ;;  %v1402_v25 = vpop.f32.mrb[9].mxu1 }
 0x2ed   : > { %v1362_v29 = vadd.f32 %v1361_v24, %v1205_v11  ;;  %v1403_v31 = vadd.f32 %v1402_v25, %v1213_v14  ;;  %v1363_v32 = vpop.f32.mrb[10].mxu0  ;;  %v1404_v34 = vpop.f32.mrb[10].mxu1 }
 0x2ee   : > { %v1556_v35 = vsub.f32 %v1360_v22, %v2477_v42  ;;  %v1558_v36 = vsub.f32 %v1401_v23, %v2480_v43  ;;  %v1364_v37 = vpop.f32.mrb[11].mxu0  ;;  %v1405_v38 = vpop.f32.mrb[11].mxu1 }
 0x2ef   : > { %v1947_v40 = vpack.c.bf16 %v1362_v29, %v1360_v22  ;;  %v1557_v41 = vsub.f32 %v1362_v29, %v2484_v44  ;;  %v1948_v46 = vpack.c.bf16 %v1403_v31, %v1401_v23  ;;  %v1559_v47 = vsub.f32 %v1403_v31, %v2488_v45 }
 0x2f0   : > { %v1564_v48 = vmul.f32 %v1556_v35, %v1556_v35  ;;  %v1566_v51 = vmul.f32 %v1558_v36, %v1558_v36 }
 0x2f1   : > { %v1515_v52 = vrot.slane %v1947_v40, %v1514_v30  ;;  %v1565_v53 = vmul.f32 %v1557_v41, %v1557_v41  ;;  %v1522_v42 = vrot.slane %v1948_v46, %v1514_v30  ;;  %v1567_v56 = vmul.f32 %v1559_v47, %v1559_v47 }
 0x2f2   : > { %v1573_v54 = vsel %vm1572_vm5, %v1564_v48, 0.0  ;;  %v1576_v63 = vsel %vm1572_vm5, %v1566_v51, 0.0 }
 0x2f3   : > { %v1574_v43 = vsel %vm1572_vm5, %v1565_v53, 0.0  ;;  %v1537_v55 = vcombine.low %v1515_v52, %v1522_v42  ;;  %v1441_v57 = vpop.f32.mrb[12].mxu0  ;;  %v1482_v58 = vpop.f32.mrb[12].mxu1  ;;  %v1578_v8 = vsel %vm1572_vm5, %v1567_v56, 0.0 }
 0x2f4   : > { %v1575_v44 = vadd.f32 %v1574_v43, %v1573_v54  ;;  %v1442_v59 = vadd.f32 %v1441_v57, %v1217_v39  ;;  %v1483_v60 = vadd.f32 %v1482_v58, %v1225_v49  ;;  %v1443_v45 = vpop.f32.mrb[13].mxu0  ;;  %v1484_v61 = vpop.f32.mrb[13].mxu1 }
 0x2f5   : > { %v1444_v0 = vadd.f32 %v1443_v45, %v1221_v33  ;;  %v1485_v1 = vadd.f32 %v1484_v61, %v1229_v50  ;;  %v1445_v28 = vpop.f32.mrb[14].mxu0  ;;  %v1486_v2 = vpop.f32.mrb[14].mxu1 }
 0x2f6   : > { %v1577_v3 = vadd.f32 %v1576_v63, %v1575_v44  ;;  %v1560_v4 = vsub.f32 %v1442_v59, %v2582_v12  ;;  %v1562_v5 = vsub.f32 %v1483_v60, %v2596_v17  ;;  %v1446_v6 = vpop.f32.mrb[15].mxu0  ;;  %v1487_v7 = vpop.f32.mrb[15].mxu1 }
 0x2f7   : > { %v1949_v9 = vpack.c.bf16 %v1444_v0, %v1442_v59  ;;  %v1561_v10 = vsub.f32 %v1444_v0, %v2593_v16  ;;  %v1950_v11 = vpack.c.bf16 %v1485_v1, %v1483_v60  ;;  %v1563_v15 = vsub.f32 %v1485_v1, %v2608_v21 }
 0x2f8   : > { %v1579_v13 = vadd.f32 %v1578_v8, %v1577_v3  ;;  %v1568_v14 = vmul.f32 %v1560_v4, %v1560_v4  ;;  %v1570_v22 = vmul.f32 %v1562_v5, %v1562_v5  ;;  %v1545_v16 = vrot.slane %v1537_v55, %v1514_v30 }
 0x2f9   : > { %v1529_v18 = vrot.slane %v1949_v9, %v1514_v30  ;;  %v1569_v19 = vmul.f32 %v1561_v10, %v1561_v10  ;;  %v1536_v20 = vrot.slane %v1950_v11, %v1514_v30  ;;  %v1571_v25 = vmul.f32 %v1563_v15, %v1563_v15 }
 0x2fa   : > { %v1580_v12 = vsel %vm1572_vm5, %v1568_v14, 0.0  ;;  %v1584_v21 = vsel %vm1572_vm5, %v1570_v22, 0.0 }
 0x2fb   : > { %v1581_v17 = vadd.f32 %v1580_v12, %v1579_v13  ;;  %v1582_v23 = vsel %vm1572_vm5, %v1569_v19, 0.0  ;;  %v1538_v24 = vcombine.low %v1529_v18, %v1536_v20  ;;  %v1586_v32 = vsel %vm1572_vm5, %v1571_v25, 0.0 }
 0x2fd   : > { %v1552_v26 = vrot.slane %v1538_v24, %v1514_v30  ;;  %v1583_v27 = vadd.f32 %v1582_v23, %v1581_v17 }
 0x2ff   : > { %v1553_v29 = vcombine.low %v1545_v16, %v1552_v26  ;;  %v1585_v31 = vadd.f32 %v1584_v21, %v1583_v27 }
 0x301   : > { %1555 = vst [vmem:[%s413_s16] sm:$0xff] %v1553_v29  ;;  %v1587_v34 = vadd.f32 %v1586_v32, %v1585_v31  ;;  %s2178_s16 = sshll.u32 %s2259_s17, 4  ;;  %s2179_s16 = int_to_ptr.vmem [resolvable:$false] %s2178_s16 }
 0x302   : > { %s2180_s0 = scalar_lea.vmem %s2179_s16, 64  ;;  %p2181_p1 = scmp.lt.s32.totalorder %s1671_s18, %s2179_s16 }
 0x303   : > { %1588 = vadd.xlane.f32.xlu1 %v1587_v34  ;;  %p2182_p2 = scmp.lt.s32.totalorder %s2180_s0, %s2174_s27 }
 0x305   : > { %p2183_p3 = por %p2182_p2, %p2181_p1 }
 0x307   : > { %p2184_p5 = pnand %p2183_p3, %p2177_p0 }
 0x309   : > { %2187 = shalt.err (!%p2184_p5)
}
 0x30a   : > { %s2188_s12 = scalar_lea.hbm %s2742_s26, 32  ;;  %s2192_s24 = scalar_lea.hbm %s2797_s6, 64 }
 0x30b   : > { %p2189_p6 = scmp.ne.s32.totalorder %s2742_s26, %s2188_s12  ;;  %p2193_p10 = scmp.lt.u32.totalorder %s2742_s26, %s2797_s6 }
 0x30c   : > { %p2194_p11 = scmp.lt.u32.totalorder %s2192_s24, %s2188_s12  ;;  %p2196_p13 = scmp.lt.u32.totalorder %s2188_s12, %s2742_s26 }
 0x30d   : > { %p2190_p7 = pnand %p2189_p6, %p2350_p4 }
 0x30e   : > { %p2195_p12 = por %p2194_p11, %p2193_p10 }
 0x30f   : > { %p2191_p9 = pneg %p2190_p7 }
 0x310   : > { %p2197_p0 = por %p2196_p13, %p2195_p12 }
 0x312   : > { %p2198_p1 = pnand %p2197_p0, %p2191_p9 }
 0x314   : > { %2201 = shalt.err (!%p2198_p1)
}
 0x315   : > { %2044 = dma.vmem_to_hbm [thread:$0]  (%p2350_p4), %s1671_s18, 32, %s2742_s26, %s1636_s13  }
 0x316   : > { %s425_s27 = scalar_lea.vmem %s2800_s9, %s2542_s20 }
 0x390   : > { %v1589_v30 = vpop.xlane.xlu1 %1588 }
 0x391   : > { %v1632_v35 = vrot.slane %v1589_v30, %v2692_v62 }
 0x393   : > { %1634 = vst.msk [vmem:[%s425_s27] sm:$0x1] %vm1626_vm4, %v1632_v35 }
 0x394 PF: > { %p2050_p2 = scmp.ge.s32.totalorder %s2252_s14, 2  ;;  %s1691_s17 = sand.u32 1, %s2232_s30  }
 0x395   : > { %s1692_s19 = scalar_lea.sflag [#allocation3], %s1691_s17 }
 0x396   : > { %p2047_p3 = pnand %p2050_p2, %p2357_p8 }
 0x398   : > { %2227 = dma.done.wait (!%p2047_p3), %s1692_s19, 32  }
 0x399   : > { %2229 = vsyncadd (!%p2047_p3), %s1692_s19, 4294967264  ;;  %s23_s14 = sadd.s32 1, %s2252_s14   ;;  %s2809_s12 = sld [smem:[#allocation5_spill]] }
 0x39a   : > { %p20_p4 = scmp.ge.s32.totalorder %s23_s14, 4   ;;  %s2810_s13 = sld [smem:[#allocation6_spill]] }
 0x39b   : > { %s2811_s30 = smov %s2236_s10  ;;  %s2812_s10 = smov %s2240_s11 }
 0x39c   : > { %s2813_s11 = smov %s2363_s22  ;;  %22 = sbr.rel (!%p20_p4) target bundleno = 6 (0x6), region = 118 }
 0x3a3   :  { %1726 = vsyncpa [#allocation3], 1 }
 0x3a4   :  { %1728 = vsyncpa [#allocation3 + $0x1], 1 }

</bundles_post_ra>
